<compile_context>
chip_gen: v7x
topology: tpu7x:2x2x1
jax: 0.10.0
libtpu: 0.0.40
codegen_flags: <defaults>
</compile_context>

<pallas_src>
import functools

import jax
import jax.numpy as jnp
from jax.experimental import pallas as pl
from jax.experimental.pallas import tpu as pltpu


def _round_up(n, m):
    return ((n + m - 1) // m) * m


def _physical_vmem_bytes():
    try:
        return int(pltpu.get_tpu_info().vmem_capacity_bytes)
    except Exception:
        return 64 << 20  # conservative fallback: v7x per-TensorCore VMEM


def _appearance_encoder_kernel(x_ref, w1_ref, b1_ref, w2_ref, b2_ref, y_ref, *, z):
    """One (TB, 128) output tile: relu(x@W1+b1)@W2+b2, softplus on lanes [z, 2z)."""
    x = x_ref[...]                                                # (TB, D_pad)

    # Layer 1 on the MXU with f32 accumulation; bias/ReLU on the VPU in f32.
    h = jnp.dot(x, w1_ref[...], preferred_element_type=jnp.float32)
    h = jnp.maximum(h + b1_ref[...], 0.0)                         # (TB, Hd_pad) f32

    # Layer 2: N padded to 128 lanes -> full MXU N and unmasked output store.
    y = jnp.dot(h.astype(w2_ref.dtype), w2_ref[...],
                preferred_element_type=jnp.float32)
    y = y + b2_ref[...]                                           # (TB, N_pad) f32

    # softplus(x) = logaddexp(x, 0) only on the scale lanes [z, 2z); the loc
    # lanes [0, z) pass through; lanes >= 2z are padding (discarded in wrapper).
    lane = jax.lax.broadcasted_iota(jnp.int32, y.shape, dimension=1)
    scale_mask = (lane >= z) & (lane < 2 * z)
    y_ref[...] = jnp.where(scale_mask, jnp.logaddexp(y, 0.0), y).astype(y_ref.dtype)


def prepare_params(w1, b1, w2, b2, compute_dtype=jnp.bfloat16):
    """One-time padding / casting of the Linear parameters (call once, not per step).

    w1: (D, hidden), b1: (hidden,), w2: (hidden, 2*z), b2: (2*z,).
    Hidden is zero-padded to a multiple of 128 (exact: relu(0)=0 and the padded
    W2 rows are 0), the output dim is zero-padded to 128 lanes, and D is padded
    to a multiple of 128 so the first contraction is lane aligned.
    """
    D, Hd = w1.shape
    two_z = w2.shape[1]
    D_pad = _round_up(D, 128)
    Hd_pad = _round_up(Hd, 128)
    N_pad = _round_up(two_z, 128)
    w1p = jnp.pad(w1, ((0, D_pad - D), (0, Hd_pad - Hd))).astype(compute_dtype)
    w2p = jnp.pad(w2, ((0, Hd_pad - Hd), (0, N_pad - two_z))).astype(compute_dtype)
    b1p = jnp.pad(b1, (0, Hd_pad - Hd)).reshape(1, Hd_pad).astype(jnp.float32)
    b2p = jnp.pad(b2, (0, N_pad - two_z)).reshape(1, N_pad).astype(jnp.float32)
    return w1p, b1p, w2p, b2p


@functools.partial(jax.jit, static_argnames=("z_what_dim", "block_b"))
def appearance_encoder_forward(crop, w1, b1, w2, b2, *, z_what_dim, block_b=1024):
    """crop: (B, C, H, W); (w1,b1,w2,b2) from prepare_params.
    Returns (z_what_loc, z_what_scale), each (B, z_what_dim) float32."""
    B = crop.shape[0]
    x = crop.reshape(B, -1)                   # NCHW row-major flatten == torch .view
    D = x.shape[1]
    D_pad, Hd_pad = w1.shape
    N_pad = w2.shape[1]
    z = z_what_dim
    compute_dtype = w1.dtype
    assert D <= D_pad and 2 * z <= N_pad, "params not prepared for this crop size"

    # Single fused pass over x (only when actually needed): row pad to a
    # multiple of 8, feature pad to D_pad, and cast to the MXU stream dtype.
    # No padding up to TB -> no extra full HBM copy for the dominant tensor.
    B8 = _round_up(B, 8)
    if (B8 != B) or (D_pad != D) or (x.dtype != compute_dtype):
        x = jnp.pad(x, ((0, B8 - B), (0, D_pad - D))).astype(compute_dtype)

    cbytes = jnp.dtype(compute_dtype).itemsize

    def working_set(tb):
        # Pallas double-buffers every in_spec/out_spec, *including* the weights
        # whose index_map is constant, so count them at 2x.
        return (2 * tb * D_pad * cbytes            # streamed x tiles
                + 2 * tb * N_pad * 4               # output tiles (f32)
                + tb * Hd_pad * 4                  # f32 hidden intermediate
                + 2 * D_pad * Hd_pad * cbytes      # W1
                + 2 * Hd_pad * N_pad * cbytes      # W2
                + 2 * (Hd_pad + N_pad) * 4)        # biases

    vmem_phys = _physical_vmem_bytes()
    vmem_budget = int(0.60 * vmem_phys)            # headroom for compiler scratch

    # Batch tile: multiple of 8, <= B8, 2-4 grid steps when the batch is large
    # enough (megacore sharding on v7x), shrunk until the working set fits VMEM.
    TB = _round_up(min(block_b, B8), 8)
    target_steps = min(4, max(1, B8 // 128))
    if target_steps > 1:
        TB = min(TB, max(128, _round_up(pl.cdiv(B8, target_steps), 8)))
    while TB > 8 and working_set(TB) > vmem_budget:
        TB = max(8, _round_up(TB // 2, 8))

    grid_steps = pl.cdiv(B8, TB)
    out_rows = grid_steps * TB                     # alloc-only padding; no data copied

    cost = pl.CostEstimate(
        flops=2 * B8 * D_pad * Hd_pad + 2 * B8 * Hd_pad * N_pad,
        transcendentals=B8 * z,
        bytes_accessed=(x.size * cbytes + w1.size * cbytes + w2.size * cbytes
                        + b1.size * 4 + b2.size * 4 + out_rows * N_pad * 4),
    )

    kernel = functools.partial(_appearance_encoder_kernel, z=z)

    y = pl.pallas_call(
        kernel,
        out_shape=jax.ShapeDtypeStruct((out_rows, N_pad), jnp.float32),
        grid=(grid_steps,),
        in_specs=[
            pl.BlockSpec((TB, D_pad), lambda i: (i, 0)),       # x: streamed per tile
            pl.BlockSpec((D_pad, Hd_pad), lambda i: (0, 0)),   # W1: VMEM resident
            pl.BlockSpec((1, Hd_pad), lambda i: (0, 0)),       # b1: VMEM resident
            pl.BlockSpec((Hd_pad, N_pad), lambda i: (0, 0)),   # W2: VMEM resident
            pl.BlockSpec((1, N_pad), lambda i: (0, 0)),        # b2: VMEM resident
        ],
        out_specs=pl.BlockSpec((TB, N_pad), lambda i: (i, 0)),
        compiler_params=pltpu.CompilerParams(
            dimension_semantics=("parallel",),
            vmem_limit_bytes=int(min(max(working_set(TB) + (4 << 20), 16 << 20),
                                     int(0.9 * vmem_phys))),
        ),
        cost_estimate=cost,
    )(x, w1, b1, w2, b2)

    y = y[:B]                                      # drop ragged-block tail rows
    return y[:, :z], y[:, z:2 * z]                 # loc, softplus'd scale (free slice)


def init_params(key, object_size, color_channels, encoder_hidden_dim, z_what_dim):
    """Deterministic init matching the nn.Linear shapes (stored transposed)."""
    object_numel = color_channels * object_size ** 2
    k1, k2, k3, k4 = jax.random.split(key, 4)
    lim1 = 1.0 / jnp.sqrt(object_numel)
    lim2 = 1.0 / jnp.sqrt(encoder_hidden_dim)
    w1 = jax.random.uniform(k1, (object_numel, encoder_hidden_dim),
                            jnp.float32, -lim1, lim1)
    b1 = jax.random.uniform(k2, (encoder_hidden_dim,), jnp.float32, -lim1, lim1)
    w2 = jax.random.uniform(k3, (encoder_hidden_dim, 2 * z_what_dim),
                            jnp.float32, -lim2, lim2)
    b2 = jax.random.uniform(k4, (2 * z_what_dim,), jnp.float32, -lim2, lim2)
    return w1, b1, w2, b2


if __name__ == "__main__":
    # Small shapes consistent with the module: 16x16 object crop, 4 channels.
    B, C, HW = 2, 4, 16
    encoder_hidden_dim = 32
    z_what_dim = 8

    key = jax.random.PRNGKey(0)
    k_crop, k_params = jax.random.split(key)
    crop = jax.random.normal(k_crop, (B, C, HW, HW), jnp.float32)
    w1, b1, w2, b2 = init_params(k_params, HW, C, encoder_hidden_dim, z_what_dim)

    # Pure-JAX reference (same math as the PyTorch module).
    x_flat = crop.reshape(B, -1)
    y_ref = jnp.maximum(x_flat @ w1 + b1, 0.0) @ w2 + b2
    loc_ref = y_ref[:, :z_what_dim]
    scale_ref = jnp.logaddexp(y_ref[:, z_what_dim:], 0.0)

    # f32 path: matches the PyTorch module within tight tolerance.
    params_f32 = prepare_params(w1, b1, w2, b2, compute_dtype=jnp.float32)
    loc32, scale32 = appearance_encoder_forward(crop, *params_f32, z_what_dim=z_what_dim)
    jax.block_until_ready((loc32, scale32))
    assert loc32.shape == (B, z_what_dim) and scale32.shape == (B, z_what_dim)
    assert jnp.allclose(loc32, loc_ref, atol=1e-5), "f32 loc mismatch"
    assert jnp.allclose(scale32, scale_ref, atol=1e-5), "f32 scale mismatch"

    # bf16 streaming path (bandwidth-optimized default); f32 accumulation, so
    # only the inputs are rounded -> loose tolerance.
    params_bf16 = prepare_params(w1, b1, w2, b2, compute_dtype=jnp.bfloat16)
    loc16, scale16 = appearance_encoder_forward(crop, *params_bf16, z_what_dim=z_what_dim)
    jax.block_until_ready((loc16, scale16))
    assert jnp.allclose(loc16, loc_ref, atol=2e-2, rtol=2e-2), "bf16 loc mismatch"
    assert jnp.allclose(scale16, scale_ref, atol=2e-2, rtol=2e-2), "bf16 scale mismatch"

    print("KERNEL_OK")
</pallas_src>

<mosaic_0001>
module attributes {stable_mosaic.version = 11 : i64} {
  func.func @_appearance_encoder_kernel(%arg0: i32, %arg1: memref<8x1024xf32, #tpu.memory_space<vmem>>, %arg2: memref<1024x128xf32, #tpu.memory_space<vmem>>, %arg3: memref<1x128xf32, #tpu.memory_space<vmem>>, %arg4: memref<128x128xf32, #tpu.memory_space<vmem>>, %arg5: memref<1x128xf32, #tpu.memory_space<vmem>>, %arg6: memref<8x128xf32, #tpu.memory_space<vmem>>) attributes {dimension_semantics = [#tpu.dimension_semantics<parallel>], iteration_bounds = array<i64: 1>, scalar_prefetch = 0 : i64, scratch_operands = 0 : i64, tpu.core_type = #tpu.core_type<tc>, window_params = [{transform_indices = @transform_0, window_bounds = array<i64: 8, 1024>}, {pipeline_mode = #tpu.pipeline_mode<synchronous>, transform_indices = @transform_1, window_bounds = array<i64: 1024, 128>}, {pipeline_mode = #tpu.pipeline_mode<synchronous>, transform_indices = @transform_2, window_bounds = array<i64: 1, 128>}, {pipeline_mode = #tpu.pipeline_mode<synchronous>, transform_indices = @transform_3, window_bounds = array<i64: 128, 128>}, {pipeline_mode = #tpu.pipeline_mode<synchronous>, transform_indices = @transform_4, window_bounds = array<i64: 1, 128>}, {transform_indices = @transform_5, window_bounds = array<i64: 8, 128>}]} {
    %c0 = arith.constant 0 : index
    %c0_0 = arith.constant 0 : index
    %0 = vector.load %arg1[%c0, %c0_0] : memref<8x1024xf32, #tpu.memory_space<vmem>>, vector<8x1024xf32>
    %c0_1 = arith.constant 0 : index
    %c0_2 = arith.constant 0 : index
    %1 = vector.load %arg2[%c0_1, %c0_2] : memref<1024x128xf32, #tpu.memory_space<vmem>>, vector<1024x128xf32>
    %cst = arith.constant dense<0.000000e+00> : vector<8x128xf32>
    %2 = tpu.matmul %0, %1, %cst {dimension_numbers = #tpu.dot_dimension_numbers<[1], [0], [0], [1], [0, 0, 1, 1], [], []>} : vector<8x1024xf32>, vector<1024x128xf32>, vector<8x128xf32> -> vector<8x128xf32>
    %c0_3 = arith.constant 0 : index
    %c0_4 = arith.constant 0 : index
    %3 = vector.load %arg3[%c0_3, %c0_4] : memref<1x128xf32, #tpu.memory_space<vmem>>, vector<1x128xf32>
    %4 = vector.broadcast %3 : vector<1x128xf32> to vector<8x128xf32>
    %5 = arith.addf %2, %4 : vector<8x128xf32>
    %cst_5 = arith.constant 0.000000e+00 : f32
    %6 = vector.broadcast %cst_5 : f32 to vector<8x128xf32>
    %7 = arith.maximumf %5, %6 : vector<8x128xf32>
    %c0_6 = arith.constant 0 : index
    %c0_7 = arith.constant 0 : index
    %8 = vector.load %arg4[%c0_6, %c0_7] : memref<128x128xf32, #tpu.memory_space<vmem>>, vector<128x128xf32>
    %cst_8 = arith.constant dense<0.000000e+00> : vector<8x128xf32>
    %9 = tpu.matmul %7, %8, %cst_8 {dimension_numbers = #tpu.dot_dimension_numbers<[1], [0], [0], [1], [0, 0, 1, 1], [], []>} : vector<8x128xf32>, vector<128x128xf32>, vector<8x128xf32> -> vector<8x128xf32>
    %c0_9 = arith.constant 0 : index
    %c0_10 = arith.constant 0 : index
    %10 = vector.load %arg5[%c0_9, %c0_10] : memref<1x128xf32, #tpu.memory_space<vmem>>, vector<1x128xf32>
    %11 = vector.broadcast %10 : vector<1x128xf32> to vector<8x128xf32>
    %12 = arith.addf %9, %11 : vector<8x128xf32>
    %13 = tpu.iota {dimensions = array<i32: 1>} : vector<8x128xi32>
    %c8_i32 = arith.constant 8 : i32
    %14 = vector.broadcast %c8_i32 : i32 to vector<8x128xi32>
    %15 = arith.cmpi sge, %13, %14 : vector<8x128xi32>
    %c16_i32 = arith.constant 16 : i32
    %16 = vector.broadcast %c16_i32 : i32 to vector<8x128xi32>
    %17 = arith.cmpi slt, %13, %16 : vector<8x128xi32>
    %18 = arith.andi %15, %17 : vector<8x128xi1>
    %cst_11 = arith.constant 0.000000e+00 : f32
    %19 = vector.broadcast %cst_11 : f32 to vector<8x128xf32>
    %20 = arith.maximumf %12, %19 : vector<8x128xf32>
    %21 = vector.broadcast %cst_11 : f32 to vector<8x128xf32>
    %22 = arith.subf %12, %21 : vector<8x128xf32>
    %23 = arith.cmpf one, %22, %22 : vector<8x128xf32>
    %24 = vector.broadcast %cst_11 : f32 to vector<8x128xf32>
    %25 = arith.addf %12, %24 : vector<8x128xf32>
    %26 = math.absf %22 : vector<8x128xf32>
    %cst_12 = arith.constant 0.000000e+00 : f32
    %27 = vector.broadcast %cst_12 : f32 to vector<8x128xf32>
    %28 = arith.subf %27, %26 : vector<8x128xf32>
    %29 = math.exp %28 : vector<8x128xf32>
    %30 = math.log1p %29 : vector<8x128xf32>
    %31 = arith.addf %20, %30 : vector<8x128xf32>
    %32 = arith.select %23, %25, %31 : vector<8x128xi1>, vector<8x128xf32>
    %33 = arith.select %18, %32, %12 : vector<8x128xi1>, vector<8x128xf32>
    %c0_13 = arith.constant 0 : index
    %c0_14 = arith.constant 0 : index
    %34 = vector.load %arg6[%c0_13, %c0_14] : memref<8x128xf32, #tpu.memory_space<vmem>>, vector<8x128xf32>
    tpu.vector_store %arg6[%c0_13, %c0_14], %33 {strides = array<i32>} : memref<8x128xf32, #tpu.memory_space<vmem>>, vector<8x128xf32>,
    return
  }
  func.func @transform_0(%arg0: i32) -> (i32, i32) {
    %c0_i32 = arith.constant 0 : i32
    %c0_i32_0 = arith.constant 0 : i32
    return %arg0, %c0_i32 : i32, i32
  }
  func.func @transform_1(%arg0: i32) -> (i32, i32) {
    %c0_i32 = arith.constant 0 : i32
    %c0_i32_0 = arith.constant 0 : i32
    %c0_i32_1 = arith.constant 0 : i32
    return %c0_i32, %c0_i32_0 : i32, i32
  }
  func.func @transform_2(%arg0: i32) -> (i32, i32) {
    %c0_i32 = arith.constant 0 : i32
    %c0_i32_0 = arith.constant 0 : i32
    %c0_i32_1 = arith.constant 0 : i32
    return %c0_i32, %c0_i32_0 : i32, i32
  }
  func.func @transform_3(%arg0: i32) -> (i32, i32) {
    %c0_i32 = arith.constant 0 : i32
    %c0_i32_0 = arith.constant 0 : i32
    %c0_i32_1 = arith.constant 0 : i32
    return %c0_i32, %c0_i32_0 : i32, i32
  }
  func.func @transform_4(%arg0: i32) -> (i32, i32) {
    %c0_i32 = arith.constant 0 : i32
    %c0_i32_0 = arith.constant 0 : i32
    %c0_i32_1 = arith.constant 0 : i32
    return %c0_i32, %c0_i32_0 : i32, i32
  }
  func.func @transform_5(%arg0: i32) -> (i32, i32) {
    %c0_i32 = arith.constant 0 : i32
    %c0_i32_0 = arith.constant 0 : i32
    return %arg0, %c0_i32 : i32, i32
  }
}

</mosaic_0001>

<bundles_post_ra>
// kernel: appearance_encoder_forward.1
= control target key start
LH: loop header
LB: loop body
LE: loop exit
PB: predicated region body
PF: predicated region fallthrough
CT: control target
= control target key end

     0   :  { %10 = vsyncpa [#allocation3], 0  ;;  %s961_s18 = smov [#allocation2]   ;;  %s1090_s0 = inlined_call_operand.vmem [shape: f32[8,1024], index: 0, kind: input, shape index: {}]   ;;  %s1091_s1 = inlined_call_operand.hbm [shape: f32[1024,128], index: 1, kind: input, shape index: {}]   ;;  %s1092_s2 = inlined_call_operand.vmem [shape: f32[1,128], index: 2, kind: input, shape index: {}]   ;;  %s1093_s3 = inlined_call_operand.vmem [shape: f32[128,128], index: 3, kind: input, shape index: {}]   ;;  %s1094_s4 = inlined_call_operand.vmem [shape: f32[1,128], index: 4, kind: input, shape index: {}]   ;;  %s1095_s5 = inlined_call_operand.vmem [shape: f32[8,128], index: 5, kind: output, shape index: {}]  }
   0x1   :  { %s18_s19 = sshll.u32 %s961_s18, 4  ;;  %s937_s22 = scalar_lea.hbm %s1091_s1, 16384  ;;  %s19_s19 = int_to_ptr.vmem [resolvable:$true] %s18_s19 }
   0x2   :  { %p938_p0 = scmp.ne.s32.totalorder %s1091_s1, %s937_s22  ;;  %p941_p1 = scmp.lt.u32.totalorder %s937_s22, %s1091_s1 }
   0x4   :  { %p943_p2 = pnand %p941_p1, %p938_p0 }
   0x6   :  { %946 = shalt.err (!%p943_p2)
}
   0x7   :  { %s947_s27 = scalar_lea.vmem %s19_s19, 16384  ;;  %p952_p4 = scmp.lt.s32.totalorder %s19_s19, %s19_s19 }
   0x8   :  { %p948_p3 = scmp.ne.s32.totalorder %s19_s19, %s947_s27  ;;  %p953_p5 = scmp.lt.s32.totalorder %s947_s27, %s947_s27 }
   0xa   :  { %p954_p6 = por %p953_p5, %p952_p4 }
   0xc   :  { %p955_p7 = pnand %p954_p6, %p948_p3 }
   0xe   :  { %958 = shalt.err (!%p955_p7)
}
   0xf   :  { %s962_s28 = smov 128   ;;  %s963_s29 = smov 8  }
  0x10   :  { %24 = dma.hbm_to_vmem [thread:$0]  %s1091_s1, 16384, %s19_s19, [#allocation3], %s962_s28, %s962_s28, %s963_s29  }
  0x11   :  { %959 = dma.done.wait [#allocation3], 16384  }
  0x12   :  { %960 = vsyncadd [#allocation3], 4294950912  ;;  %v58_v0 = vld [vmem:[#allocation2 + $0x80] sm:$0xff]  ;;  %v59_v1 = vld [vmem:[#allocation2 + $0x88] sm:$0xff]  ;;  %vm965_vm0 = vmmov 0  }
  0x13   :  { %v42_v2 = vld [vmem:[#allocation2] sm:$0xff]  ;;  %v775_v3 = vpack.c.bf16 %v59_v1, %v58_v0  ;;  %v43_v4 = vld [vmem:[#allocation2 + $0x8] sm:$0xff]  ;;  %v60_v11 = vld [vmem:[#allocation2 + $0x90] sm:$0xff] }
  0x14   :  { %v90_v5 = vld [vmem:[#allocation2 + $0x180] sm:$0xff]  ;;  %v91_v6 = vld [vmem:[#allocation2 + $0x188] sm:$0xff]  ;;  %v777_v7 = vpack.c.bf16 %v43_v4, %v42_v2  ;;  %v61_v13 = vld [vmem:[#allocation2 + $0x98] sm:$0xff] }
  0x15   :  { %v807_v8 = vpack.c.bf16 %v91_v6, %v90_v5  ;;  %v74_v9 = vld [vmem:[#allocation2 + $0x100] sm:$0xff]  ;;  %v75_v10 = vld [vmem:[#allocation2 + $0x108] sm:$0xff]  ;;  %776 = vmatprep.subr.bf16.mxu0 %v775_v3  ;;  %v44_v14 = vld [vmem:[#allocation2 + $0x10] sm:$0xff]  ;;  %v779_v16 = vpack.c.bf16 %v61_v13, %v60_v11 }
  0x16   :  { %v809_v12 = vpack.c.bf16 %v75_v10, %v74_v9  ;;  %v45_v15 = vld [vmem:[#allocation2 + $0x18] sm:$0xff]  ;;  %778 = vmatpush3.bf16.msra.mxu0 %v777_v7  ;;  %v92_v18 = vld [vmem:[#allocation2 + $0x190] sm:$0xff]  ;;  %v62_v23 = vld [vmem:[#allocation2 + $0xa0] sm:$0xff] }
  0x17   :  { %808 = vmatprep.subr.bf16.mxu1 %v807_v8  ;;  %v781_v17 = vpack.c.bf16 %v45_v15, %v44_v14  ;;  %v93_v19 = vld [vmem:[#allocation2 + $0x198] sm:$0xff]  ;;  %v76_v20 = vld [vmem:[#allocation2 + $0x110] sm:$0xff]  ;;  %v63_v24 = vld [vmem:[#allocation2 + $0xa8] sm:$0xff]  ;;  %780 = vmatprep.subr.bf16.mxu0 %v779_v16 }
  0x18   :  { %810 = vmatpush3.bf16.msra.mxu1 %v809_v12  ;;  %v811_v21 = vpack.c.bf16 %v93_v19, %v92_v18  ;;  %v77_v22 = vld [vmem:[#allocation2 + $0x118] sm:$0xff]  ;;  %v783_v26 = vpack.c.bf16 %v63_v24, %v62_v23  ;;  %v46_v27 = vld [vmem:[#allocation2 + $0x20] sm:$0xff]  ;;  %v47_v28 = vld [vmem:[#allocation2 + $0x28] sm:$0xff] }
  0x19   :  { %v813_v25 = vpack.c.bf16 %v77_v22, %v76_v20  ;;  %v94_v29 = vld [vmem:[#allocation2 + $0x1a0] sm:$0xff]  ;;  %v95_v30 = vld [vmem:[#allocation2 + $0x1a8] sm:$0xff]  ;;  %v785_v33 = vpack.c.bf16 %v47_v28, %v46_v27  ;;  %v64_v35 = vld [vmem:[#allocation2 + $0xb0] sm:$0xff] }
  0x1a   :  { %812 = vmatprep.subr.bf16.mxu1 %v811_v21  ;;  %v78_v31 = vld [vmem:[#allocation2 + $0x120] sm:$0xff]  ;;  %v79_v32 = vld [vmem:[#allocation2 + $0x128] sm:$0xff]  ;;  %782 = vmatpush3.bf16.msra.mxu0 %v781_v17  ;;  %v815_v34 = vpack.c.bf16 %v95_v30, %v94_v29  ;;  %v65_v36 = vld [vmem:[#allocation2 + $0xb8] sm:$0xff] }
  0x1b   :  { %v48_v37 = vld [vmem:[#allocation2 + $0x30] sm:$0xff]  ;;  %784 = vmatprep.subr.bf16.mxu0 %v783_v26  ;;  %v817_v38 = vpack.c.bf16 %v79_v32, %v78_v31  ;;  %v787_v39 = vpack.c.bf16 %v65_v36, %v64_v35  ;;  %v49_v40 = vld [vmem:[#allocation2 + $0x38] sm:$0xff]  ;;  %v66_v46 = vld [vmem:[#allocation2 + $0xc0] sm:$0xff] }
  0x1c   :  { %814 = vmatpush3.bf16.msra.mxu1 %v813_v25  ;;  %v96_v41 = vld [vmem:[#allocation2 + $0x1b0] sm:$0xff]  ;;  %v97_v42 = vld [vmem:[#allocation2 + $0x1b8] sm:$0xff]  ;;  %v67_v47 = vld [vmem:[#allocation2 + $0xc8] sm:$0xff]  ;;  %v789_v48 = vpack.c.bf16 %v49_v40, %v48_v37 }
  0x1d   :  { %816 = vmatprep.subr.bf16.mxu1 %v815_v34  ;;  %v819_v43 = vpack.c.bf16 %v97_v42, %v96_v41  ;;  %v80_v44 = vld [vmem:[#allocation2 + $0x130] sm:$0xff]  ;;  %v81_v45 = vld [vmem:[#allocation2 + $0x138] sm:$0xff]  ;;  %v98_v49 = vld [vmem:[#allocation2 + $0x1c0] sm:$0xff]  ;;  %v791_v52 = vpack.c.bf16 %v67_v47, %v66_v46 }
  0x1e   :  { %786 = vmatpush3.bf16.msra.mxu0 %v785_v33  ;;  %v99_v50 = vld [vmem:[#allocation2 + $0x1c8] sm:$0xff]  ;;  %v821_v51 = vpack.c.bf16 %v81_v45, %v80_v44  ;;  %v50_v53 = vld [vmem:[#allocation2 + $0x40] sm:$0xff]  ;;  %v68_v58 = vld [vmem:[#allocation2 + $0xd0] sm:$0xff] }
  0x1f   :  { %788 = vmatprep.subr.bf16.mxu0 %v787_v39  ;;  %v51_v54 = vld [vmem:[#allocation2 + $0x48] sm:$0xff]  ;;  %v82_v55 = vld [vmem:[#allocation2 + $0x140] sm:$0xff]  ;;  %v823_v56 = vpack.c.bf16 %v99_v50, %v98_v49  ;;  %v69_v59 = vld [vmem:[#allocation2 + $0xd8] sm:$0xff] }
  0x20   :  { %818 = vmatpush3.bf16.msra.mxu1 %v817_v38  ;;  %v83_v57 = vld [vmem:[#allocation2 + $0x148] sm:$0xff]  ;;  %v100_v60 = vld [vmem:[#allocation2 + $0x1d0] sm:$0xff]  ;;  %v101_v61 = vld [vmem:[#allocation2 + $0x1d8] sm:$0xff]  ;;  %v793_v62 = vpack.c.bf16 %v51_v54, %v50_v53  ;;  %v795_v0 = vpack.c.bf16 %v69_v59, %v68_v58 }
  0x21   :  { %820 = vmatprep.subr.bf16.mxu1 %v819_v43  ;;  %v825_v63 = vpack.c.bf16 %v83_v57, %v82_v55  ;;  %v52_v1 = vld [vmem:[#allocation2 + $0x50] sm:$0xff]  ;;  %v53_v2 = vld [vmem:[#allocation2 + $0x58] sm:$0xff]  ;;  %v827_v4 = vpack.c.bf16 %v101_v61, %v100_v60  ;;  %v70_v6 = vld [vmem:[#allocation2 + $0xe0] sm:$0xff] }
  0x22   :  { %790 = vmatpush3.bf16.msra.mxu0 %v789_v48  ;;  %v84_v3 = vld [vmem:[#allocation2 + $0x150] sm:$0xff]  ;;  %v85_v5 = vld [vmem:[#allocation2 + $0x158] sm:$0xff]  ;;  %v71_v7 = vld [vmem:[#allocation2 + $0xe8] sm:$0xff]  ;;  %v797_v10 = vpack.c.bf16 %v53_v2, %v52_v1 }
  0x23   :  { %792 = vmatprep.subr.bf16.mxu0 %v791_v52  ;;  %v102_v8 = vld [vmem:[#allocation2 + $0x1e0] sm:$0xff]  ;;  %v103_v9 = vld [vmem:[#allocation2 + $0x1e8] sm:$0xff]  ;;  %v829_v13 = vpack.c.bf16 %v85_v5, %v84_v3  ;;  %v799_v14 = vpack.c.bf16 %v71_v7, %v70_v6  ;;  %v72_v19 = vld [vmem:[#allocation2 + $0xf0] sm:$0xff] }
  0x24   :  { %822 = vmatpush3.bf16.msra.mxu1 %v821_v51  ;;  %v54_v11 = vld [vmem:[#allocation2 + $0x60] sm:$0xff]  ;;  %v55_v12 = vld [vmem:[#allocation2 + $0x68] sm:$0xff]  ;;  %v831_v18 = vpack.c.bf16 %v103_v9, %v102_v8  ;;  %v73_v20 = vld [vmem:[#allocation2 + $0xf8] sm:$0xff] }
  0x25   :  { %824 = vmatprep.subr.bf16.mxu1 %v823_v56  ;;  %v86_v15 = vld [vmem:[#allocation2 + $0x160] sm:$0xff]  ;;  %v87_v16 = vld [vmem:[#allocation2 + $0x168] sm:$0xff]  ;;  %v37_v21 = vld [vmem:[%s1090_s0 + $0x18] sm:$0xff]  ;;  %v801_v24 = vpack.c.bf16 %v55_v12, %v54_v11  ;;  %v803_v26 = vpack.c.bf16 %v73_v20, %v72_v19 }
  0x26   :  { %794 = vmatpush3.bf16.msra.mxu0 %v793_v62  ;;  %v35_v17 = vld [vmem:[%s1090_s0 + $0x8] sm:$0xff]  ;;  %v104_v22 = vld [vmem:[#allocation2 + $0x1f0] sm:$0xff]  ;;  %v105_v23 = vld [vmem:[#allocation2 + $0x1f8] sm:$0xff]  ;;  %311 = vmatprep.mubr.f32.mxu1 %v37_v21  ;;  %v833_v25 = vpack.c.bf16 %v87_v16, %v86_v15 }
  0x27   :  { %796 = vmatprep.subr.bf16.mxu0 %v795_v0  ;;  %241 = vmatprep.mubr.f32.mxu0 %v35_v17  ;;  %v56_v27 = vld [vmem:[#allocation2 + $0x70] sm:$0xff]  ;;  %v57_v28 = vld [vmem:[#allocation2 + $0x78] sm:$0xff]  ;;  %v835_v30 = vpack.c.bf16 %v105_v23, %v104_v22  ;;  %v122_v32 = vld [vmem:[#allocation2 + $0x280] sm:$0xff] }
  0x28   :  { %826 = vmatpush3.bf16.msra.mxu1 %v825_v63  ;;  %v88_v29 = vld [vmem:[#allocation2 + $0x170] sm:$0xff]  ;;  %v89_v31 = vld [vmem:[#allocation2 + $0x178] sm:$0xff]  ;;  %v123_v33 = vld [vmem:[#allocation2 + $0x288] sm:$0xff]  ;;  %v805_v36 = vpack.c.bf16 %v57_v28, %v56_v27 }
  0x29   :  { %828 = vmatprep.subr.bf16.mxu1 %v827_v4  ;;  %v154_v34 = vld [vmem:[#allocation2 + $0x380] sm:$0xff]  ;;  %v155_v35 = vld [vmem:[#allocation2 + $0x388] sm:$0xff]  ;;  %v837_v37 = vpack.c.bf16 %v89_v31, %v88_v29  ;;  %v839_v38 = vpack.c.bf16 %v123_v33, %v122_v32  ;;  %v124_v44 = vld [vmem:[#allocation2 + $0x290] sm:$0xff] }
  0x2a   :  { %798 = vmatpush3.bf16.msra.mxu0 %v797_v10  ;;  %v106_v39 = vld [vmem:[#allocation2 + $0x200] sm:$0xff]  ;;  %v107_v40 = vld [vmem:[#allocation2 + $0x208] sm:$0xff]  ;;  %v871_v42 = vpack.c.bf16 %v155_v35, %v154_v34  ;;  %v125_v45 = vld [vmem:[#allocation2 + $0x298] sm:$0xff] }
  0x2b   :  { %800 = vmatprep.subr.bf16.mxu0 %v799_v14  ;;  %v138_v41 = vld [vmem:[#allocation2 + $0x300] sm:$0xff]  ;;  %v139_v43 = vld [vmem:[#allocation2 + $0x308] sm:$0xff]  ;;  %v156_v46 = vld [vmem:[#allocation2 + $0x390] sm:$0xff]  ;;  %v841_v49 = vpack.c.bf16 %v107_v40, %v106_v39  ;;  %v843_v52 = vpack.c.bf16 %v125_v45, %v124_v44 }
  0x2c   :  { %830 = vmatpush3.bf16.msra.mxu1 %v829_v13  ;;  %v157_v47 = vld [vmem:[#allocation2 + $0x398] sm:$0xff]  ;;  %v34_v48 = vld [vmem:[%s1090_s0] sm:$0xff]  ;;  %v36_v50 = vld [vmem:[%s1090_s0 + $0x10] sm:$0xff]  ;;  %v873_v51 = vpack.c.bf16 %v139_v43, %v138_v41 }
  0x2d   :  { %832 = vmatprep.subr.bf16.mxu1 %v831_v18  ;;  %v108_v53 = vld [vmem:[#allocation2 + $0x210] sm:$0xff]  ;;  %v109_v54 = vld [vmem:[#allocation2 + $0x218] sm:$0xff]  ;;  %v875_v56 = vpack.c.bf16 %v157_v47, %v156_v46  ;;  %v126_v58 = vld [vmem:[#allocation2 + $0x2a0] sm:$0xff] }
  0x2e   :  { %802 = vmatpush3.bf16.msra.mxu0 %v801_v24  ;;  %v140_v55 = vld [vmem:[#allocation2 + $0x310] sm:$0xff]  ;;  %v141_v57 = vld [vmem:[#allocation2 + $0x318] sm:$0xff]  ;;  %v127_v59 = vld [vmem:[#allocation2 + $0x2a8] sm:$0xff]  ;;  %v845_v62 = vpack.c.bf16 %v109_v54, %v108_v53 }
  0x2f   :  { %804 = vmatprep.subr.bf16.mxu0 %v803_v26  ;;  %v158_v60 = vld [vmem:[#allocation2 + $0x3a0] sm:$0xff]  ;;  %v159_v61 = vld [vmem:[#allocation2 + $0x3a8] sm:$0xff]  ;;  %v877_v63 = vpack.c.bf16 %v141_v57, %v140_v55  ;;  %v847_v0 = vpack.c.bf16 %v127_v59, %v126_v58  ;;  %v128_v6 = vld [vmem:[#allocation2 + $0x2b0] sm:$0xff] }
  0x30   :  { %834 = vmatpush3.bf16.msra.mxu1 %v833_v25  ;;  %v110_v1 = vld [vmem:[#allocation2 + $0x220] sm:$0xff]  ;;  %v111_v2 = vld [vmem:[#allocation2 + $0x228] sm:$0xff]  ;;  %v879_v4 = vpack.c.bf16 %v159_v61, %v158_v60  ;;  %v129_v7 = vld [vmem:[#allocation2 + $0x2b8] sm:$0xff] }
  0x31   :  { %836 = vmatprep.subr.bf16.mxu1 %v835_v30  ;;  %v142_v3 = vld [vmem:[#allocation2 + $0x320] sm:$0xff]  ;;  %v143_v5 = vld [vmem:[#allocation2 + $0x328] sm:$0xff]  ;;  %v160_v8 = vld [vmem:[#allocation2 + $0x3b0] sm:$0xff]  ;;  %v849_v10 = vpack.c.bf16 %v111_v2, %v110_v1  ;;  %v851_v12 = vpack.c.bf16 %v129_v7, %v128_v6 }
  0x32   :  { %806 = vmatpush3.bf16.msra.mxu0 %v805_v36  ;;  %v161_v9 = vld [vmem:[#allocation2 + $0x3b8] sm:$0xff]  ;;  %v881_v11 = vpack.c.bf16 %v143_v5, %v142_v3  ;;  %v112_v13 = vld [vmem:[#allocation2 + $0x230] sm:$0xff]  ;;  %v130_v18 = vld [vmem:[#allocation2 + $0x2c0] sm:$0xff] }
  0x33   :  { %840 = vmatprep.subr.bf16.mxu0 %v839_v38  ;;  %v113_v14 = vld [vmem:[#allocation2 + $0x238] sm:$0xff]  ;;  %v144_v15 = vld [vmem:[#allocation2 + $0x330] sm:$0xff]  ;;  %v883_v16 = vpack.c.bf16 %v161_v9, %v160_v8  ;;  %v131_v19 = vld [vmem:[#allocation2 + $0x2c8] sm:$0xff] }
  0x34   :  { %838 = vmatpush3.bf16.msra.mxu1 %v837_v37  ;;  %v145_v17 = vld [vmem:[#allocation2 + $0x338] sm:$0xff]  ;;  %v162_v20 = vld [vmem:[#allocation2 + $0x3c0] sm:$0xff]  ;;  %v163_v21 = vld [vmem:[#allocation2 + $0x3c8] sm:$0xff]  ;;  %v853_v22 = vpack.c.bf16 %v113_v14, %v112_v13  ;;  %v855_v26 = vpack.c.bf16 %v131_v19, %v130_v18 }
  0x35   :  { %872 = vmatprep.subr.bf16.mxu1 %v871_v42  ;;  %242 = vmatmul.mubr.f32.vlgmr.msra.gmra.mrb[0].mxu0 %v34_v48  ;;  %v39_v23 = vld [vmem:[%s1090_s0 + $0x28] sm:$0xff]  ;;  %v41_v24 = vld [vmem:[%s1090_s0 + $0x38] sm:$0xff]  ;;  %v885_v25 = vpack.c.bf16 %v145_v17, %v144_v15  ;;  %v114_v27 = vld [vmem:[#allocation2 + $0x240] sm:$0xff]  ;;  %v887_v30 = vpack.c.bf16 %v163_v21, %v162_v20 }
  0x36   :  { %842 = vmatpush3.bf16.msra.mxu0 %v841_v49  ;;  %v115_v28 = vld [vmem:[#allocation2 + $0x248] sm:$0xff]  ;;  %v146_v29 = vld [vmem:[#allocation2 + $0x340] sm:$0xff]  ;;  %v132_v32 = vld [vmem:[#allocation2 + $0x2d0] sm:$0xff]  ;;  %381 = vmatprep.mubr.f32.mxu0 %v39_v23 }
  0x37   :  { %312 = vmatmul.mubr.f32.vlgmr.msra.gmra.mrb[0].mxu1 %v36_v50  ;;  %844 = vmatprep.subr.bf16.mxu0 %v843_v52  ;;  %v147_v31 = vld [vmem:[#allocation2 + $0x348] sm:$0xff]  ;;  %v133_v33 = vld [vmem:[#allocation2 + $0x2d8] sm:$0xff]  ;;  %v164_v34 = vld [vmem:[#allocation2 + $0x3d0] sm:$0xff]  ;;  %v857_v36 = vpack.c.bf16 %v115_v28, %v114_v27 }
  0x38   :  { %874 = vmatpush3.bf16.msra.mxu1 %v873_v51  ;;  %v165_v35 = vld [vmem:[#allocation2 + $0x3d8] sm:$0xff]  ;;  %451 = vmatprep.mubr.f32.mxu1 %v41_v24  ;;  %v889_v37 = vpack.c.bf16 %v147_v31, %v146_v29  ;;  %v859_v38 = vpack.c.bf16 %v133_v33, %v132_v32  ;;  %v116_v39 = vld [vmem:[#allocation2 + $0x250] sm:$0xff]  ;;  %v134_v44 = vld [vmem:[#allocation2 + $0x2e0] sm:$0xff]  ;;  %v966_v33 = vmov 0.0  }
  0x39   :  { %876 = vmatprep.subr.bf16.mxu1 %v875_v56  ;;  %v117_v40 = vld [vmem:[#allocation2 + $0x258] sm:$0xff]  ;;  %v148_v41 = vld [vmem:[#allocation2 + $0x350] sm:$0xff]  ;;  %v891_v42 = vpack.c.bf16 %v165_v35, %v164_v34  ;;  %v135_v45 = vld [vmem:[#allocation2 + $0x2e8] sm:$0xff] }
  0x3a   :  { %846 = vmatpush3.bf16.msra.mxu0 %v845_v62  ;;  %v149_v43 = vld [vmem:[#allocation2 + $0x358] sm:$0xff]  ;;  %v166_v46 = vld [vmem:[#allocation2 + $0x3e0] sm:$0xff]  ;;  %v167_v47 = vld [vmem:[#allocation2 + $0x3e8] sm:$0xff]  ;;  %v861_v48 = vpack.c.bf16 %v117_v40, %v116_v39  ;;  %v863_v50 = vpack.c.bf16 %v135_v45, %v134_v44 }
  0x3b   :  { %848 = vmatprep.subr.bf16.mxu0 %v847_v0  ;;  %v893_v49 = vpack.c.bf16 %v149_v43, %v148_v41  ;;  %v118_v51 = vld [vmem:[#allocation2 + $0x260] sm:$0xff]  ;;  %v119_v52 = vld [vmem:[#allocation2 + $0x268] sm:$0xff]  ;;  %v895_v54 = vpack.c.bf16 %v167_v47, %v166_v46  ;;  %v136_v56 = vld [vmem:[#allocation2 + $0x2f0] sm:$0xff] }
  0x3c   :  { %878 = vmatpush3.bf16.msra.mxu1 %v877_v63  ;;  %v150_v53 = vld [vmem:[#allocation2 + $0x360] sm:$0xff]  ;;  %v151_v55 = vld [vmem:[#allocation2 + $0x368] sm:$0xff]  ;;  %v137_v57 = vld [vmem:[#allocation2 + $0x2f8] sm:$0xff]  ;;  %v865_v60 = vpack.c.bf16 %v119_v52, %v118_v51 }
  0x3d   :  { %880 = vmatprep.subr.bf16.mxu1 %v879_v4  ;;  %v168_v58 = vld [vmem:[#allocation2 + $0x3f0] sm:$0xff]  ;;  %v169_v59 = vld [vmem:[#allocation2 + $0x3f8] sm:$0xff]  ;;  %v897_v61 = vpack.c.bf16 %v151_v55, %v150_v53  ;;  %v867_v62 = vpack.c.bf16 %v137_v57, %v136_v56  ;;  %v38_v6 = vld [vmem:[%s1090_s0 + $0x20] sm:$0xff] }
  0x3e   :  { %850 = vmatpush3.bf16.msra.mxu0 %v849_v10  ;;  %v120_v63 = vld [vmem:[#allocation2 + $0x270] sm:$0xff]  ;;  %v121_v0 = vld [vmem:[#allocation2 + $0x278] sm:$0xff]  ;;  %v899_v1 = vpack.c.bf16 %v169_v59, %v168_v58  ;;  %v458_v8 = vld [vmem:[%s1093_s3] sm:$0xff] }
  0x3f   :  { %852 = vmatprep.subr.bf16.mxu0 %v851_v12  ;;  %v152_v2 = vld [vmem:[#allocation2 + $0x370] sm:$0xff]  ;;  %v153_v3 = vld [vmem:[#allocation2 + $0x378] sm:$0xff]  ;;  %v869_v4 = vpack.c.bf16 %v121_v0, %v120_v63  ;;  %v459_v9 = vld [vmem:[%s1093_s3 + $0x8] sm:$0xff] }
  0x40   :  { %882 = vmatpush3.bf16.msra.mxu1 %v881_v11  ;;  %v901_v5 = vpack.c.bf16 %v153_v3, %v152_v2  ;;  %v40_v7 = vld [vmem:[%s1090_s0 + $0x30] sm:$0xff]  ;;  %v964_v11 = vmov 0.0|0.0   ;;  %v904_v12 = vpack.c.bf16 %v459_v9, %v458_v8  ;;  %v461_v13 = vld [vmem:[%s1093_s3 + $0x18] sm:$0xff]  ;;  %v462_v15 = vld [vmem:[%s1093_s3 + $0x20] sm:$0xff] }
  0x41   :  { %884 = vmatprep.subr.bf16.mxu1 %v883_v16  ;;  %v460_v10 = vld [vmem:[%s1093_s3 + $0x10] sm:$0xff]  ;;  %v463_v16 = vld [vmem:[%s1093_s3 + $0x28] sm:$0xff]  ;;  %v465_v19 = vld [vmem:[%s1093_s3 + $0x38] sm:$0xff] }
  0x42   :  { %854 = vmatpush3.bf16.msra.mxu0 %v853_v22  ;;  %v907_v14 = vpack.c.bf16 %v461_v13, %v460_v10  ;;  %v910_v17 = vpack.c.bf16 %v463_v16, %v462_v15  ;;  %v464_v18 = vld [vmem:[%s1093_s3 + $0x30] sm:$0xff]  ;;  %v466_v21 = vld [vmem:[%s1093_s3 + $0x40] sm:$0xff]  ;;  %v467_v22 = vld [vmem:[%s1093_s3 + $0x48] sm:$0xff] }
  0x43   :  { %856 = vmatprep.subr.bf16.mxu0 %v855_v26  ;;  %v913_v20 = vpack.c.bf16 %v465_v19, %v464_v18  ;;  %v916_v23 = vpack.c.bf16 %v467_v22, %v466_v21  ;;  %v468_v24 = vld [vmem:[%s1093_s3 + $0x50] sm:$0xff]  ;;  %v470_v27 = vld [vmem:[%s1093_s3 + $0x60] sm:$0xff]  ;;  %v471_v28 = vld [vmem:[%s1093_s3 + $0x68] sm:$0xff] }
  0x44   :  { %886 = vmatpush3.bf16.msra.mxu1 %v885_v25  ;;  %v469_v25 = vld [vmem:[%s1093_s3 + $0x58] sm:$0xff]  ;;  %v922_v29 = vpack.c.bf16 %v471_v28, %v470_v27  ;;  %v581_v35 = vld [vmem:[%s1092_s2] ss:$0 sm:$0xff] }
  0x45   :  { %888 = vmatprep.subr.bf16.mxu1 %v887_v30  ;;  %v919_v26 = vpack.c.bf16 %v469_v25, %v468_v24  ;;  %v472_v30 = vld [vmem:[%s1093_s3 + $0x70] sm:$0xff]  ;;  %v473_v31 = vld [vmem:[%s1093_s3 + $0x78] sm:$0xff]  ;;  %v582_v52 = vld [vmem:[%s1094_s4] ss:$0 sm:$0xff] }
  0x46   :  { %858 = vmatpush3.bf16.msra.mxu0 %v857_v36  ;;  %v925_v32 = vpack.c.bf16 %v473_v31, %v472_v30 }
  0x47   :  { %860 = vmatprep.subr.bf16.mxu0 %v859_v38 }
  0x48   :  { %890 = vmatpush3.bf16.msra.mxu1 %v889_v37 }
  0x49   :  { %892 = vmatprep.subr.bf16.mxu1 %v891_v42 }
  0x4a   :  { %862 = vmatpush3.bf16.msra.mxu0 %v861_v48 }
  0x4b   :  { %864 = vmatprep.subr.bf16.mxu0 %v863_v50 }
  0x4c   :  { %894 = vmatpush3.bf16.msra.mxu1 %v893_v49 }
  0x4d   :  { %896 = vmatprep.subr.bf16.mxu1 %v895_v54 }
  0x4e   :  { %866 = vmatpush3.bf16.msra.mxu0 %v865_v60 }
  0x4f   :  { %868 = vmatprep.subr.bf16.mxu0 %v867_v62 }
  0x50   :  { %898 = vmatpush3.bf16.msra.mxu1 %v897_v61  ;;  %v551_v61 = vlaneseq }
  0x51   :  { %900 = vmatprep.subr.bf16.mxu1 %v899_v1 }
  0x52   :  { %870 = vmatpush3.bf16.msra.mxu0 %v869_v4  ;;  %v552_v63 = vand.u32 127, %v551_v61 }
  0x53   :  { %903 = vmatprep.subr.bf16.mxu0 %v964_v11 }
  0x54   :  { %902 = vmatpush3.bf16.msra.mxu1 %v901_v5  ;;  %vm553_vm1 = vcmp.ge.s32.totalorder %v552_v63, 8  ;;  %vm554_vm2 = vcmp.lt.s32.totalorder %v552_v63, 16 }
  0x55   :  { %382 = vmatmul.mubr.f32.vlgmr.msra.gmra.mrb[2].mxu0 %v38_v6  ;;  %vm555_vm4 = vmand %vm553_vm1, %vm554_vm2 }
  0x56   :  { %905 = vmatpush3.bf16.msra.mxu0 %v904_v12  ;;  %772 = vmatprep.mubr.msk.f32.mxu0 %vm965_vm0, %v966_v33 }
  0x57   :  { %452 = vmatmul.mubr.f32.vlgmr.msra.gmra.mrb[2].mxu1 %v40_v7  ;;  %906 = vmatprep.subr.bf16.mxu0 %v964_v11 }
  0x5a   :  { %908 = vmatpush3.bf16.msra.mxu0 %v907_v14 }
  0x5b   :  { %909 = vmatprep.subr.bf16.mxu0 %v964_v11 }
  0x5e   :  { %911 = vmatpush3.bf16.msra.mxu0 %v910_v17 }
  0x5f   :  { %912 = vmatprep.subr.bf16.mxu0 %v964_v11 }
  0x62   :  { %914 = vmatpush3.bf16.msra.mxu0 %v913_v20 }
  0x63   :  { %915 = vmatprep.subr.bf16.mxu0 %v964_v11 }
  0x66   :  { %917 = vmatpush3.bf16.msra.mxu0 %v916_v23 }
  0x67   :  { %918 = vmatprep.subr.bf16.mxu0 %v964_v11 }
  0x6a   :  { %920 = vmatpush3.bf16.msra.mxu0 %v919_v26 }
  0x6b   :  { %921 = vmatprep.subr.bf16.mxu0 %v964_v11 }
  0x6e   :  { %923 = vmatpush3.bf16.msra.mxu0 %v922_v29 }
  0x6f   :  { %924 = vmatprep.subr.bf16.mxu0 %v964_v11 }
  0x72   :  { %926 = vmatpush3.bf16.msra.mxu0 %v925_v32 }
 0x108   :  { %v615_v34 = vpop.f32.mrb[0].mxu0 }
 0x109   :  { %v616_v36 = vpop.f32.mrb[1].mxu0 }
 0x10a   :  { %v650_v37 = vpop.f32.mrb[0].mxu1  ;;  %v617_v38 = vadd.f32 %v616_v36, %v615_v34 }
 0x10b   :  { %v651_v39 = vpop.f32.mrb[1].mxu1 }
 0x10c   :  { %v652_v40 = vadd.f32 %v651_v39, %v650_v37  ;;  %v244_v41 = vadd.f32 %v617_v38, %v581_v35 }
 0x10e   :  { %v314_v42 = vadd.f32 %v652_v40, %v244_v41 }
 0x128   :  { %v685_v43 = vpop.f32.mrb[2].mxu0 }
 0x129   :  { %v686_v44 = vpop.f32.mrb[3].mxu0 }
 0x12a   :  { %v720_v45 = vpop.f32.mrb[2].mxu1  ;;  %v687_v46 = vadd.f32 %v686_v44, %v685_v43 }
 0x12b   :  { %v721_v47 = vpop.f32.mrb[3].mxu1 }
 0x12c   :  { %v722_v48 = vadd.f32 %v721_v47, %v720_v45  ;;  %v384_v49 = vadd.f32 %v687_v46, %v314_v42 }
 0x12e   :  { %v454_v50 = vadd.f32 %v722_v48, %v384_v49 }
 0x130   :  { %v457_v51 = vmax.f32 %v454_v50, 0.0 }
 0x132   :  { %773 = vmatmul.mubr.f32.vlgmr.msra.gmra.mrb[4].mxu0 %v457_v51 }
 0x205   :  { %v547_v53 = vpop.f32.mrb[4].mxu0 }
 0x206   :  { %v548_v54 = vadd.f32 %v582_v52, %v547_v53  ;;  %v774_v55 = vpop.f32.mrb[5].mxu0 }
 0x208   :  { %v559_v56 = vand.u32 2147483647, %v548_v54  ;;  %v556_v5 = vmax.f32 %v548_v54, 0.0  ;;  %vm557_vm5 = vcmp.ne.f32.partialorder %v548_v54, %v548_v54 }
 0x20a   :  { %v560_v57 = vsub.f32 0.0, %v559_v56 }
 0x20c   :  { %v561_v58 = vmul.f32 1.442695, %v560_v57 }
 0x20e   :  { %933 = vpow2.f32 %v561_v58 }
 0x218   :  { %v934_v59 = vpop.eup %933 }
 0x219   :  { %v563_v60 = vadd.f32 1.0, %v934_v59  ;;  %v566_v62 = vmul.f32 -0.5, %v934_v59  ;;  %v569_v1 = vand.u32 2147483647, %v934_v59 }
 0x21b   :  { %935 = vlog2.f32 %v563_v60  ;;  %v567_v0 = vadd.f32 1.0, %v566_v62  ;;  %vm570_vm3 = vcmp.lt.f32.partialorder %v569_v1, 0.0004427343 }
 0x21d   :  { %v568_v4 = vmul.f32 %v934_v59, %v567_v0 }
 0x225   :  { %v936_v2 = vpop.eup %935 }
 0x226   :  { %v565_v3 = vmul.f32 0.6931472, %v936_v2 }
 0x228   :  { %v571_v6 = vsel %vm570_vm3, %v568_v4, %v565_v3 }
 0x229   :  { %v572_v7 = vadd.f32 %v571_v6, %v556_v5 }
 0x22b   :  { %v573_v8 = vsel %vm557_vm5, %v548_v54, %v572_v7 }
 0x22c   :  { %v574_v9 = vsel %vm555_vm4, %v573_v8, %v548_v54 }
 0x22d   :  { %575 = vst [vmem:[%s1095_s5] sm:$0xff] %v574_v9 }
 0x22e   :  { %580 = vsyncpa [#allocation3], 1 }

</bundles_post_ra>
